<compile_context>
chip_gen: v5e
topology: v5e:2x2
jax: 0.10.0
libtpu: 0.0.40
codegen_flags: <defaults>
</compile_context>

<pallas_src>
import functools

import jax
import jax.numpy as jnp
from jax.experimental import pallas as pl
from jax.experimental.pallas import tpu as pltpu


def _round_up(x, m):
    return ((x + m - 1) // m) * m


def _sublane(itemsize):
    # VMEM tiling is (sublane, 128): 8 sublanes for 4-byte, 16 for 2-byte,
    # 32 for 1-byte dtypes.
    return max(8, 32 // itemsize)


# ---------- Path A: pure top/bottom crop -> contiguous per-plane memcpy ------
def _crop_kernel_contig(x_hbm, o_ref, sem, *, start, cols, ch_block, tail):
    """x_hbm: (N, H*W) in HBM.  o_ref: (ch_block, out_h*W) VMEM block."""
    i = pl.program_id(0)
    row0 = pl.multiple_of(i * ch_block, ch_block)
    if tail == 0:
        cp = pltpu.make_async_copy(
            x_hbm.at[pl.ds(row0, ch_block), pl.ds(start, cols)], o_ref, sem.at[0]
        )
        cp.start()
        cp.wait()
    else:
        last = pl.num_programs(0) - 1

        @pl.when(i < last)
        def _():
            cp = pltpu.make_async_copy(
                x_hbm.at[pl.ds(row0, ch_block), pl.ds(start, cols)],
                o_ref,
                sem.at[0],
            )
            cp.start()
            cp.wait()

        @pl.when(i == last)
        def _():
            cp = pltpu.make_async_copy(
                x_hbm.at[pl.ds(row0, tail), pl.ds(start, cols)],
                o_ref.at[pl.ds(0, tail)],
                sem.at[0],
            )
            cp.start()
            cp.wait()


# ---------- Path B: wide crop -> strided window DMA --------------------------
def _crop_kernel_strided(
    x_hbm, o_ref, sem, *, top, left, out_h, out_w, ch_block, tail
):
    """x_hbm: (N, H, W) in HBM.  o_ref: (ch_block, out_h, out_w) VMEM block."""
    i = pl.program_id(0)
    row0 = pl.multiple_of(i * ch_block, ch_block)
    if tail == 0:
        cp = pltpu.make_async_copy(
            x_hbm.at[pl.ds(row0, ch_block), pl.ds(top, out_h), pl.ds(left, out_w)],
            o_ref,
            sem.at[0],
        )
        cp.start()
        cp.wait()
    else:
        last = pl.num_programs(0) - 1

        @pl.when(i < last)
        def _():
            cp = pltpu.make_async_copy(
                x_hbm.at[
                    pl.ds(row0, ch_block), pl.ds(top, out_h), pl.ds(left, out_w)
                ],
                o_ref,
                sem.at[0],
            )
            cp.start()
            cp.wait()

        @pl.when(i == last)
        def _():
            cp = pltpu.make_async_copy(
                x_hbm.at[pl.ds(row0, tail), pl.ds(top, out_h), pl.ds(left, out_w)],
                o_ref.at[pl.ds(0, tail)],
                sem.at[0],
            )
            cp.start()
            cp.wait()


# ---------- Path C: narrow crop -> contiguous plane load + VMEM slice --------
def _crop_kernel_vmem(x_ref, o_ref, *, top, left, out_h, out_w):
    """x_ref: (ch_block, H, W) pipelined VMEM block; crop is a static slice."""
    o_ref[...] = x_ref[:, top : top + out_h, left : left + out_w]


def crop2d(x, crop, *, use_pallas=True):
    """Crop input using slicing. Assumes BCHW data.  crop = (left, right, top, bottom)."""
    assert len(crop) == 4
    left, right, top, bottom = crop
    B, C, H, W = x.shape
    out_h = H - top - bottom
    out_w = W - left - right
    assert out_h > 0 and out_w > 0

    if not use_pallas:
        # Fast path: a plain XLA slice can fuse with neighbours (zero traffic).
        return x[:, :, top : H - bottom, left : W - right]

    N = B * C
    itemsize = jnp.dtype(x.dtype).itemsize
    sub = _sublane(itemsize)
    out_bytes = N * out_h * out_w * itemsize

    # ---- generation-aware scoped-VMEM budget (honest padded accounting) ----
    try:
        vmem_cap = int(pltpu.get_tpu_info().vmem_capacity_bytes)
    except Exception:  # off-TPU tracing / older runtimes: assume smallest (v7x)
        vmem_cap = 64 * 1024 * 1024
    # Request at most half the physical VMEM; never more than 64 MiB.
    vmem_limit = int(min(vmem_cap // 2, 64 * 1024 * 1024))
    # Headroom for semaphores / compiler scratch inside the requested limit.
    budget = (vmem_limit * 3) // 4

    compiler_params = pltpu.CompilerParams(
        dimension_semantics=("parallel",),
        vmem_limit_bytes=vmem_limit,
    )

    contiguous = left == 0 and right == 0
    narrow = out_w * itemsize < 512  # strided rows this short waste read BW

    if contiguous:
        # ---------------- Path A: one contiguous run per plane ---------------
        cols = out_h * W  # out_w == W
        x2 = x.reshape(N, H * W)
        per_row = _round_up(cols, 128) * itemsize  # padded lane width
        ch_block = min(N, max(1, budget // (2 * per_row)))  # double-buffered
        if ch_block < N:
            # second-to-last dim of the (ch_block, cols) block must stay
            # sublane-tile friendly when it is not the full array dim.
            ch_block = min(N, max(sub, (ch_block // sub) * sub))
        tail = N % ch_block
        grid = (pl.cdiv(N, ch_block),)

        kernel = functools.partial(
            _crop_kernel_contig,
            start=top * W,
            cols=cols,
            ch_block=ch_block,
            tail=tail,
        )
        out2 = pl.pallas_call(
            kernel,
            out_shape=jax.ShapeDtypeStruct((N, cols), x.dtype),
            grid_spec=pltpu.PrefetchScalarGridSpec(
                num_scalar_prefetch=0,
                grid=grid,
                in_specs=[pl.BlockSpec(memory_space=pl.ANY)],
                out_specs=pl.BlockSpec((ch_block, cols), lambda i: (i, 0)),
                scratch_shapes=[pltpu.SemaphoreType.DMA((1,))],
            ),
            compiler_params=compiler_params,
            cost_estimate=pl.CostEstimate(
                flops=0, transcendentals=0, bytes_accessed=2 * out_bytes
            ),
        )(x2)
        return out2.reshape(B, C, out_h, out_w)

    x2 = x.reshape(N, H, W)

    if narrow:
        # ------- Path C: contiguous full-plane load, crop as VMEM slice ------
        # Trades (H*W)/(out_h*out_w) extra *contiguous* read bytes for
        # eliminating tiny strided DMA bursts (out_w*itemsize < 512 B).
        in_row = _round_up(H, sub) * _round_up(W, 128) * itemsize
        out_row = _round_up(out_h, sub) * _round_up(out_w, 128) * itemsize
        ch_block = min(N, max(1, budget // (2 * (in_row + out_row))))
        grid = (pl.cdiv(N, ch_block),)

        kernel = functools.partial(
            _crop_kernel_vmem, top=top, left=left, out_h=out_h, out_w=out_w
        )
        out2 = pl.pallas_call(
            kernel,
            out_shape=jax.ShapeDtypeStruct((N, out_h, out_w), x.dtype),
            grid_spec=pltpu.PrefetchScalarGridSpec(
                num_scalar_prefetch=0,
                grid=grid,
                in_specs=[pl.BlockSpec((ch_block, H, W), lambda i: (i, 0, 0))],
                out_specs=pl.BlockSpec(
                    (ch_block, out_h, out_w), lambda i: (i, 0, 0)
                ),
            ),
            compiler_params=compiler_params,
            cost_estimate=pl.CostEstimate(
                flops=0,
                transcendentals=0,
                bytes_accessed=N * H * W * itemsize + out_bytes,
            ),
        )(x2)
        return out2.reshape(B, C, out_h, out_w)

    # ----------- Path B: wide crop, strided DMA of exactly the window --------
    out_row = _round_up(out_h, sub) * _round_up(out_w, 128) * itemsize
    ch_block = min(N, max(1, budget // (2 * out_row)))
    tail = N % ch_block
    grid = (pl.cdiv(N, ch_block),)

    kernel = functools.partial(
        _crop_kernel_strided,
        top=top,
        left=left,
        out_h=out_h,
        out_w=out_w,
        ch_block=ch_block,
        tail=tail,
    )
    out2 = pl.pallas_call(
        kernel,
        out_shape=jax.ShapeDtypeStruct((N, out_h, out_w), x.dtype),
        grid_spec=pltpu.PrefetchScalarGridSpec(
            num_scalar_prefetch=0,
            grid=grid,
            in_specs=[pl.BlockSpec(memory_space=pl.ANY)],
            out_specs=pl.BlockSpec((ch_block, out_h, out_w), lambda i: (i, 0, 0)),
            scratch_shapes=[pltpu.SemaphoreType.DMA((1,))],
        ),
        compiler_params=compiler_params,
        cost_estimate=pl.CostEstimate(
            flops=0, transcendentals=0, bytes_accessed=2 * out_bytes
        ),
    )(x2)
    return out2.reshape(B, C, out_h, out_w)


if __name__ == "__main__":
    key = jax.random.PRNGKey(0)
    B, C, H, W = 2, 4, 16, 16
    x = jax.random.normal(key, (B, C, H, W), dtype=jnp.float32)

    # Path C: narrow W-crop (out_w * 4 B < 512 B) — pipelined load + VMEM slice.
    crop = (1, 2, 3, 1)  # (left, right, top, bottom)
    out = crop2d(x, crop)
    jax.block_until_ready(out)
    l, r, t, b = crop
    ref = x[:, :, t : H - b, l : W - r]
    assert out.shape == ref.shape, (out.shape, ref.shape)
    assert bool(jnp.array_equal(out, ref)), "Path C mismatch vs reference slice"

    # Path A: pure top/bottom crop — single contiguous memcpy per plane.
    crop_a = (0, 0, 3, 1)
    out_a = crop2d(x, crop_a)
    jax.block_until_ready(out_a)
    ref_a = x[:, :, 3 : H - 1, :]
    assert out_a.shape == ref_a.shape, (out_a.shape, ref_a.shape)
    assert bool(jnp.array_equal(out_a, ref_a)), "Path A mismatch vs reference slice"

    # Path B: wide W-crop (out_w * 4 B >= 512 B) — strided window DMA.
    xw = jax.random.normal(jax.random.PRNGKey(0), (1, 2, 8, 256), dtype=jnp.float32)
    crop_b = (4, 4, 2, 2)
    out_b = crop2d(xw, crop_b)
    jax.block_until_ready(out_b)
    ref_b = xw[:, :, 2:6, 4:252]
    assert out_b.shape == ref_b.shape, (out_b.shape, ref_b.shape)
    assert bool(jnp.array_equal(out_b, ref_b)), "Path B mismatch vs reference slice"

    print("KERNEL_OK")
</pallas_src>

<mosaic_0001>
module attributes {stable_mosaic.version = 11 : i64} {
  func.func @_crop_kernel_vmem(%arg0: i32, %arg1: memref<8x16x16xf32, #tpu.memory_space<vmem>>, %arg2: memref<8x12x13xf32, #tpu.memory_space<vmem>>) attributes {dimension_semantics = [#tpu.dimension_semantics<parallel>], iteration_bounds = array<i64: 1>, scalar_prefetch = 0 : i64, scratch_operands = 0 : i64, tpu.core_type = #tpu.core_type<tc>, window_params = [{transform_indices = @transform_0, window_bounds = array<i64: 8, 16, 16>}, {transform_indices = @transform_1, window_bounds = array<i64: 8, 12, 13>}]} {
    %c0 = arith.constant 0 : index
    %c3 = arith.constant 3 : index
    %c1 = arith.constant 1 : index
    %0 = vector.load %arg1[%c0, %c3, %c1] : memref<8x16x16xf32, #tpu.memory_space<vmem>>, vector<8x12x13xf32>
    %c0_0 = arith.constant 0 : index
    %c0_1 = arith.constant 0 : index
    %c0_2 = arith.constant 0 : index
    %1 = vector.load %arg2[%c0_0, %c0_1, %c0_2] : memref<8x12x13xf32, #tpu.memory_space<vmem>>, vector<8x12x13xf32>
    tpu.vector_store %arg2[%c0_0, %c0_1, %c0_2], %0 {strides = array<i32>} : memref<8x12x13xf32, #tpu.memory_space<vmem>>, vector<8x12x13xf32>,
    return
  }
  func.func @transform_0(%arg0: i32) -> (i32, i32, i32) {
    %c0_i32 = arith.constant 0 : i32
    %c0_i32_0 = arith.constant 0 : i32
    %c0_i32_1 = arith.constant 0 : i32
    return %arg0, %c0_i32, %c0_i32_0 : i32, i32, i32
  }
  func.func @transform_1(%arg0: i32) -> (i32, i32, i32) {
    %c0_i32 = arith.constant 0 : i32
    %c0_i32_0 = arith.constant 0 : i32
    %c0_i32_1 = arith.constant 0 : i32
    return %arg0, %c0_i32, %c0_i32_0 : i32, i32, i32
  }
}

</mosaic_0001>

<bundles_post_ra>
// kernel: tpu_custom_call.1
= control target key start
LH: loop header
LB: loop body
LE: loop exit
PB: predicated region body
PF: predicated region fallthrough
CT: control target
= control target key end

     0   :  { %6 = vsyncpa [#allocation3], 0  ;;  %s157_s9 = smov [#allocation2]   ;;  %s158_s11 = smov 128   ;;  %s238_s0 = inlined_call_operand.hbm [shape: f32[8,16,16], index: 0, kind: input, shape index: {}]   ;;  %s239_s1 = inlined_call_operand.vmem [shape: f32[8,12,13], index: 1, kind: output, shape index: {}]  }
   0x1   :  { %s11_s8 = sshll.u32 %s238_s0, 4  ;;  %s13_s10 = sshll.u32 %s157_s9, 4  ;;  %s12_s8 = int_to_ptr.hbm [resolvable:$true] %s11_s8  ;;  %s14_s10 = int_to_ptr.vmem [resolvable:$true] %s13_s10 }
   0x2   :  { %s159_s12 = smov 8  }
   0x3   :  { %19 = dma.hbm_to_vmem [thread:$0]  %s12_s8, 2048, %s14_s10, [#allocation3], %s158_s11, %s158_s11, %s159_s12  }
   0x4   :  { %155 = dma.done.wait [#allocation3], 2048  }
   0x5   :  { %156 = vsyncadd [#allocation3], 4294965248  ;;  %v24_v0 = vld [vmem:[#allocation2 + $0x3] sm:$0xff]  ;;  %v26_v1 = vld [vmem:[#allocation2 + $0x13] sm:$0xff]  ;;  %s160_s13 = smov 127   ;;  %vm104_vm0 = vcmask 105472  }
   0x6   :  { %56 = vrot.lane.b32.xlu0 %v24_v0, %s160_s13  ;;  %60 = vrot.lane.b32.xlu1 %v26_v1, %s160_s13  ;;  %v28_v2 = vld [vmem:[#allocation2 + $0x23] sm:$0xff]  ;;  %v25_v3 = vld [vmem:[#allocation2 + $0xb] sm:$0xf]  ;;  %v27_v4 = vld [vmem:[#allocation2 + $0x1b] sm:$0xf]  ;;  %vm106_vm1 = vcmask 101376  }
   0x7   :  { %64 = vrot.lane.b32.xlu2 %v28_v2, %s160_s13  ;;  %v29_v5 = vld [vmem:[#allocation2 + $0x2b] sm:$0xf]  ;;  %v30_v6 = vld [vmem:[#allocation2 + $0x33] sm:$0xff]  ;;  %v31_v7 = vld [vmem:[#allocation2 + $0x3b] sm:$0xf] }
   0x8   :  { %v32_v8 = vld [vmem:[#allocation2 + $0x43] sm:$0xff]  ;;  %v33_v9 = vld [vmem:[#allocation2 + $0x4b] sm:$0xf]  ;;  %v34_v10 = vld [vmem:[#allocation2 + $0x53] sm:$0xff] }
   0x9   :  { %v35_v11 = vld [vmem:[#allocation2 + $0x5b] sm:$0xf]  ;;  %v36_v12 = vld [vmem:[#allocation2 + $0x63] sm:$0xff]  ;;  %v37_v13 = vld [vmem:[#allocation2 + $0x6b] sm:$0xf] }
   0xa   :  { %v38_v14 = vld [vmem:[#allocation2 + $0x73] sm:$0xff]  ;;  %v39_v15 = vld [vmem:[#allocation2 + $0x7b] sm:$0xf] }
   0xe   :  { %58 = vrot.lane.b32.xlu0 %v25_v3, %s160_s13  ;;  %62 = vrot.lane.b32.xlu1 %v27_v4, %s160_s13 }
   0xf   :  { %66 = vrot.lane.b32.xlu2 %v29_v5, %s160_s13 }
  0x16   :  { %68 = vrot.lane.b32.xlu0 %v30_v6, %s160_s13  ;;  %70 = vrot.lane.b32.xlu1 %v31_v7, %s160_s13 }
  0x17   :  { %72 = vrot.lane.b32.xlu2 %v32_v8, %s160_s13 }
  0x1e   :  { %74 = vrot.lane.b32.xlu0 %v33_v9, %s160_s13  ;;  %76 = vrot.lane.b32.xlu1 %v34_v10, %s160_s13 }
  0x1f   :  { %78 = vrot.lane.b32.xlu2 %v35_v11, %s160_s13 }
  0x26   :  { %80 = vrot.lane.b32.xlu0 %v36_v12, %s160_s13  ;;  %82 = vrot.lane.b32.xlu1 %v37_v13, %s160_s13 }
  0x27   :  { %84 = vrot.lane.b32.xlu2 %v38_v14, %s160_s13 }
  0x2e   :  { %86 = vrot.lane.b32.xlu0 %v39_v15, %s160_s13 }
  0x61   :  { %v65_v16 = vpop.permute.xlu2 %64 }
  0x62   :  { %110 = vst.msk [vmem:[%s239_s1 + $0x20] sm:$0xff] %vm104_vm0, %v65_v16 }
  0x69   :  { %v67_v17 = vpop.permute.xlu2 %66 }
  0x6a   :  { %111 = vst.msk [vmem:[%s239_s1 + $0x28] sm:$0xf] %vm106_vm1, %v67_v17 }
  0x71   :  { %v73_v18 = vpop.permute.xlu2 %72 }
  0x72   :  { %114 = vst.msk [vmem:[%s239_s1 + $0x40] sm:$0xff] %vm104_vm0, %v73_v18 }
  0x78   :  { %v57_v19 = vpop.permute.xlu0 %56  ;;  %v61_v20 = vpop.permute.xlu1 %60 }
  0x79   :  { %105 = vst.msk [vmem:[%s239_s1] sm:$0xff] %vm104_vm0, %v57_v19  ;;  %v79_v21 = vpop.permute.xlu2 %78 }
  0x7a   :  { %108 = vst.msk [vmem:[%s239_s1 + $0x10] sm:$0xff] %vm104_vm0, %v61_v20 }
  0x7b   :  { %117 = vst.msk [vmem:[%s239_s1 + $0x58] sm:$0xf] %vm106_vm1, %v79_v21 }
  0x80   :  { %v59_v22 = vpop.permute.xlu0 %58  ;;  %v63_v23 = vpop.permute.xlu1 %62 }
  0x81   :  { %107 = vst.msk [vmem:[%s239_s1 + $0x8] sm:$0xf] %vm106_vm1, %v59_v22  ;;  %v85_v24 = vpop.permute.xlu2 %84 }
  0x82   :  { %109 = vst.msk [vmem:[%s239_s1 + $0x18] sm:$0xf] %vm106_vm1, %v63_v23 }
  0x83   :  { %120 = vst.msk [vmem:[%s239_s1 + $0x70] sm:$0xff] %vm104_vm0, %v85_v24 }
  0x88   :  { %v69_v25 = vpop.permute.xlu0 %68  ;;  %v71_v26 = vpop.permute.xlu1 %70 }
  0x89   :  { %112 = vst.msk [vmem:[%s239_s1 + $0x30] sm:$0xff] %vm104_vm0, %v69_v25 }
  0x8a   :  { %113 = vst.msk [vmem:[%s239_s1 + $0x38] sm:$0xf] %vm106_vm1, %v71_v26 }
  0x90   :  { %v75_v27 = vpop.permute.xlu0 %74  ;;  %v77_v28 = vpop.permute.xlu1 %76 }
  0x91   :  { %115 = vst.msk [vmem:[%s239_s1 + $0x48] sm:$0xf] %vm106_vm1, %v75_v27 }
  0x92   :  { %116 = vst.msk [vmem:[%s239_s1 + $0x50] sm:$0xff] %vm104_vm0, %v77_v28 }
  0x98   :  { %v81_v29 = vpop.permute.xlu0 %80  ;;  %v83_v30 = vpop.permute.xlu1 %82 }
  0x99   :  { %118 = vst.msk [vmem:[%s239_s1 + $0x60] sm:$0xff] %vm104_vm0, %v81_v29 }
  0x9a   :  { %119 = vst.msk [vmem:[%s239_s1 + $0x68] sm:$0xf] %vm106_vm1, %v83_v30 }
  0xa0   :  { %v87_v31 = vpop.permute.xlu0 %86 }
  0xa1   :  { %121 = vst.msk [vmem:[%s239_s1 + $0x78] sm:$0xf] %vm106_vm1, %v87_v31 }
  0xa2   :  { %126 = vsyncpa [#allocation3], 1 }

</bundles_post_ra>
